<compile_context>
chip_gen: v7x
topology: tpu7x:2x2x1
jax: 0.10.0
libtpu: 0.0.40
codegen_flags: <defaults>
</compile_context>

<pallas_src>
import functools

import jax
import jax.numpy as jnp
from jax.experimental import pallas as pl
from jax.experimental.pallas import tpu as pltpu


def _patch_embed_kernel(p_ref, w_ref, pos_ref, out_ref):
    # p_ref:   (tb*N, K) bf16  patch rows for this batch tile (streamed)
    # w_ref:   (K, E)    bf16  patch-embedding weight (grid-invariant)
    # pos_ref: (tb*N, E) f32   pos_emb[1:] + conv_b, pre-tiled per batch tile
    # out_ref: (tb*N, E) f32
    emb = jnp.dot(p_ref[...], w_ref[...],
                  preferred_element_type=jnp.float32)          # MXU, f32 accum
    out_ref[...] = (emb + pos_ref[...]).astype(out_ref.dtype)  # aligned VPU add


def _pick_batch_block(B, N, target_rows=256):
    """Pick a batch tile tb (divisor of B) such that:
         - the block's row count tb*N is sublane-aligned (%8==0) or covers
           the full B*N extent (both are legal BlockSpec shapes), and
         - tb*N is >= target_rows when possible (tall MXU LHS)."""
    divisors = [d for d in range(1, B + 1) if B % d == 0]
    # smallest divisor giving an aligned, sufficiently tall tile
    for d in divisors:
        if (d * N) % 8 == 0 and d * N >= target_rows:
            return d
    # otherwise the largest aligned divisor (fewer, taller steps)
    for d in reversed(divisors):
        if (d * N) % 8 == 0:
            return d
    # fall back to the whole batch: block == full array dim is always legal
    return B


def vit_input_layer(x, conv_w, conv_b, cls_token, pos_emb,
                    *, patch_size_y, patch_size_x, batch_block=None):
    """x: (B, C, Y, X) NCHW float32.  Returns (B, n_patches + 1, emb_dim)."""
    B, C, Y, X = x.shape
    E = conv_w.shape[0]
    py, px = patch_size_y, patch_size_x
    Gy, Gx = Y // py, X // px
    N = Gy * Gx
    K = C * py * px

    tb = _pick_batch_block(B, N) if batch_block is None else batch_block
    assert B % tb == 0
    rows = tb * N

    # --- layout glue (plain JAX; fused into the kernel input pipeline) ------
    # Non-overlapping patches, channel-major flattening (== NCHW strided conv:
    # k index order (c, ky, kx), patch index order (gy, gx)).
    patches = x.reshape(B, C, Gy, py, Gx, px)
    patches = jnp.transpose(patches, (0, 2, 4, 1, 3, 5)).reshape(B * N, K)
    patches = patches.astype(jnp.bfloat16)            # MXU-native, 1/2 HBM bytes

    # conv weight (E, C, py, px) -> (K, E), bf16 for the MXU
    w_mat = conv_w.reshape(E, K).T.astype(jnp.bfloat16)

    pos_full = pos_emb.reshape(N + 1, E).astype(jnp.float32)
    # Fold conv bias into the patch-row positional embedding; pre-tile to one
    # batch tile so the in-kernel add is a single aligned f32 VPU add.
    pos_tile = jnp.tile(pos_full[1:] + conv_b.reshape(1, E), (tb, 1))  # (rows, E)
    # cls row is batch-invariant: cls_token + pos_emb[0] (added outside kernel)
    cls_row = cls_token.reshape(1, E).astype(jnp.float32) + pos_full[0:1]

    grid = (B // tb,)
    out = pl.pallas_call(
        _patch_embed_kernel,
        out_shape=jax.ShapeDtypeStruct((B * N, E), x.dtype),
        grid_spec=pltpu.PrefetchScalarGridSpec(
            num_scalar_prefetch=0,
            grid=grid,
            in_specs=[
                pl.BlockSpec((rows, K), lambda i: (i, 0)),   # patch rows (streamed)
                pl.BlockSpec((K, E), lambda i: (0, 0)),      # weight (grid-invariant)
                pl.BlockSpec((rows, E), lambda i: (0, 0)),   # pos+bias (grid-invariant)
            ],
            out_specs=pl.BlockSpec((rows, E), lambda i: (i, 0)),
        ),
        compiler_params=pltpu.CompilerParams(
            dimension_semantics=("parallel",),               # megacore on v7x
            allow_input_fusion=[True, False, False],         # fuse transpose+cast
        ),
    )(patches, w_mat, pos_tile)

    y = out.reshape(B, N, E)
    cls_full = jnp.broadcast_to(cls_row.reshape(1, 1, E), (B, 1, E)).astype(y.dtype)
    return jnp.concatenate([cls_full, y], axis=1)            # (B, N+1, E)


def _reference(x, conv_w, conv_b, cls_token, pos_emb, *, py, px):
    """Pure-JAX f32 reference matching the PyTorch forward."""
    B = x.shape[0]
    y = jax.lax.conv_general_dilated(
        x, conv_w, window_strides=(py, px), padding="VALID",
        dimension_numbers=("NCHW", "OIHW", "NCHW"))
    y = y + conv_b.reshape(1, -1, 1, 1)
    B_, E, Gy, Gx = y.shape
    y = y.reshape(B_, E, Gy * Gx).transpose(0, 2, 1)          # (B, N, E)
    cls = jnp.broadcast_to(cls_token, (B, 1, E))
    y = jnp.concatenate([cls, y], axis=1)
    return y + pos_emb


if __name__ == "__main__":
    # module config (small, consistent with the forward)
    in_channels = 4
    emb_dim = 32
    input_size_y = 16
    input_size_x = 16
    patch_size_y = 4
    patch_size_x = 4
    B = 2
    n_patches = (input_size_x // patch_size_x) * (input_size_y // patch_size_y)

    key = jax.random.PRNGKey(0)
    kx, kw, kb, kc, kp = jax.random.split(key, 5)

    x = jax.random.normal(kx, (B, in_channels, input_size_y, input_size_x),
                          dtype=jnp.float32)
    conv_w = jax.random.normal(
        kw, (emb_dim, in_channels, patch_size_y, patch_size_x),
        dtype=jnp.float32) * 0.02
    conv_b = jax.random.normal(kb, (emb_dim,), dtype=jnp.float32) * 0.02
    cls_token = jax.random.normal(kc, (1, 1, emb_dim), dtype=jnp.float32)
    pos_emb = jax.random.normal(kp, (1, n_patches + 1, emb_dim),
                                dtype=jnp.float32)

    fwd = jax.jit(functools.partial(vit_input_layer,
                                    patch_size_y=patch_size_y,
                                    patch_size_x=patch_size_x))
    out = fwd(x, conv_w, conv_b, cls_token, pos_emb)
    out = jax.block_until_ready(out)

    ref = _reference(x, conv_w, conv_b, cls_token, pos_emb,
                     py=patch_size_y, px=patch_size_x)
    assert out.shape == (B, n_patches + 1, emb_dim), out.shape
    # bf16 MXU inputs vs f32 conv reference -> loosened tolerance
    assert jnp.allclose(out, ref, atol=2e-2, rtol=2e-2), \
        float(jnp.max(jnp.abs(out - ref)))

    print("KERNEL_OK")
</pallas_src>

<mosaic_0001>
module attributes {stable_mosaic.version = 11 : i64} {
  func.func @_patch_embed_kernel(%arg0: i32, %arg1: memref<32x64xbf16, #tpu.memory_space<vmem>>, %arg2: memref<64x32xbf16, #tpu.memory_space<vmem>>, %arg3: memref<32x32xf32, #tpu.memory_space<vmem>>, %arg4: memref<32x32xf32, #tpu.memory_space<vmem>>) attributes {dimension_semantics = [#tpu.dimension_semantics<parallel>], iteration_bounds = array<i64: 1>, scalar_prefetch = 0 : i64, scratch_operands = 0 : i64, tpu.core_type = #tpu.core_type<tc>, window_params = [{transform_indices = @transform_0, window_bounds = array<i64: 32, 64>}, {pipeline_mode = #tpu.pipeline_mode<synchronous>, transform_indices = @transform_1, window_bounds = array<i64: 64, 32>}, {pipeline_mode = #tpu.pipeline_mode<synchronous>, transform_indices = @transform_2, window_bounds = array<i64: 32, 32>}, {transform_indices = @transform_3, window_bounds = array<i64: 32, 32>}]} {
    %c0 = arith.constant 0 : index
    %c0_0 = arith.constant 0 : index
    %0 = vector.load %arg1[%c0, %c0_0] : memref<32x64xbf16, #tpu.memory_space<vmem>>, vector<32x64xbf16>
    %c0_1 = arith.constant 0 : index
    %c0_2 = arith.constant 0 : index
    %1 = vector.load %arg2[%c0_1, %c0_2] : memref<64x32xbf16, #tpu.memory_space<vmem>>, vector<64x32xbf16>
    %cst = arith.constant dense<0.000000e+00> : vector<32x32xf32>
    %2 = tpu.matmul %0, %1, %cst {dimension_numbers = #tpu.dot_dimension_numbers<[1], [0], [0], [1], [0, 0, 1, 1], [], []>} : vector<32x64xbf16>, vector<64x32xbf16>, vector<32x32xf32> -> vector<32x32xf32>
    %c0_3 = arith.constant 0 : index
    %c0_4 = arith.constant 0 : index
    %3 = vector.load %arg3[%c0_3, %c0_4] : memref<32x32xf32, #tpu.memory_space<vmem>>, vector<32x32xf32>
    %4 = arith.addf %2, %3 : vector<32x32xf32>
    %c0_5 = arith.constant 0 : index
    %c0_6 = arith.constant 0 : index
    %5 = vector.load %arg4[%c0_5, %c0_6] : memref<32x32xf32, #tpu.memory_space<vmem>>, vector<32x32xf32>
    tpu.vector_store %arg4[%c0_5, %c0_6], %4 {strides = array<i32>} : memref<32x32xf32, #tpu.memory_space<vmem>>, vector<32x32xf32>,
    return
  }
  func.func @transform_0(%arg0: i32) -> (i32, i32) {
    %c0_i32 = arith.constant 0 : i32
    %c0_i32_0 = arith.constant 0 : i32
    return %arg0, %c0_i32 : i32, i32
  }
  func.func @transform_1(%arg0: i32) -> (i32, i32) {
    %c0_i32 = arith.constant 0 : i32
    %c0_i32_0 = arith.constant 0 : i32
    %c0_i32_1 = arith.constant 0 : i32
    return %c0_i32, %c0_i32_0 : i32, i32
  }
  func.func @transform_2(%arg0: i32) -> (i32, i32) {
    %c0_i32 = arith.constant 0 : i32
    %c0_i32_0 = arith.constant 0 : i32
    %c0_i32_1 = arith.constant 0 : i32
    return %c0_i32, %c0_i32_0 : i32, i32
  }
  func.func @transform_3(%arg0: i32) -> (i32, i32) {
    %c0_i32 = arith.constant 0 : i32
    %c0_i32_0 = arith.constant 0 : i32
    return %arg0, %c0_i32 : i32, i32
  }
}

</mosaic_0001>

<bundles_post_ra>
// kernel: vit_input_layer.1
= control target key start
LH: loop header
LB: loop body
LE: loop exit
PB: predicated region body
PF: predicated region fallthrough
CT: control target
= control target key end

     0   :  { %vm65_vm0 = vcmask 523264   ;;  %vm121_vm1 = vcmask 261120   ;;  %s224_s1 = inlined_call_operand.vmem [shape: bf16[64,32], index: 1, kind: input, shape index: {}]   ;;  %s225_s0 = inlined_call_operand.vmem [shape: bf16[32,64], index: 0, kind: input, shape index: {}]   ;;  %s226_s2 = inlined_call_operand.vmem [shape: f32[32,32], index: 2, kind: input, shape index: {}]   ;;  %s227_s3 = inlined_call_operand.vmem [shape: f32[32,32], index: 3, kind: output, shape index: {}]  }
   0x1   :  { %v156_v0 = vld [vmem:[%s224_s1] sm:$0xff]   ;;  %v157_v1 = vld [vmem:[%s224_s1 + $0x8] sm:$0xff]   ;;  %v158_v2 = vld [vmem:[%s224_s1 + $0x10] sm:$0xff]  }
   0x2   :  { %144 = vmatprep.subr.bf16.mxu0 %v156_v0  ;;  %v160_v3 = vld [vmem:[%s225_s0] sm:$0xff]   ;;  %v159_v4 = vld [vmem:[%s224_s1 + $0x18] sm:$0xff]   ;;  %v161_v5 = vld [vmem:[%s225_s0 + $0x8] sm:$0xff]  }
   0x3   :  { %145 = vmatpush3.bf16.msra.mxu0 %v156_v0  ;;  %152 = vmatprep.mubr.msk.bf16.mxu0 %vm65_vm0, %v160_v3  ;;  %v29_v6 = vld [vmem:[%s226_s2 + $0x10] sm:$0xff]  ;;  %v27_v7 = vld [vmem:[%s226_s2] sm:$0xff]  ;;  %v30_v9 = vld [vmem:[%s226_s2 + $0x18] sm:$0xff] }
   0x4   :  { %146 = vmatprep.subr.bf16.mxu0 %v157_v1  ;;  %v28_v12 = vld [vmem:[%s226_s2 + $0x8] sm:$0xff] }
   0x7   :  { %147 = vmatpush3.bf16.msra.mxu0 %v157_v1 }
   0x8   :  { %148 = vmatprep.subr.bf16.mxu0 %v158_v2 }
   0xb   :  { %149 = vmatpush3.bf16.msra.mxu0 %v158_v2 }
   0xc   :  { %150 = vmatprep.subr.bf16.mxu0 %v159_v4 }
   0xf   :  { %151 = vmatpush3.bf16.msra.mxu0 %v159_v4 }
  0x12   :  { %153 = vmatmul.mubr.msk.bf16.vlgmr.msra.gmra.mrb[0].mxu0 %vm65_vm0, %v161_v5 }
  0xe5   :  { %v154_v8 = vpop.f32.mrb[0].mxu0 }
  0xe6   :  { %v115_v10 = vadd.f32 %v154_v8, %v29_v6  ;;  %v106_v11 = vpop.f32.mrb[1].mxu0 }
  0xe7   :  { %v107_v13 = vadd.f32 %v106_v11, %v27_v7  ;;  %v155_v14 = vpop.f32.mrb[2].mxu0 }
  0xe8   :  { %124 = vst.msk [vmem:[%s227_s3 + $0x10] sm:$0xff] %vm121_vm1, %v115_v10  ;;  %v118_v15 = vadd.f32 %v155_v14, %v30_v9  ;;  %v109_v16 = vpop.f32.mrb[3].mxu0 }
  0xe9   :  { %122 = vst.msk [vmem:[%s227_s3] sm:$0xff] %vm121_vm1, %v107_v13  ;;  %v110_v17 = vadd.f32 %v109_v16, %v28_v12 }
  0xea   :  { %125 = vst.msk [vmem:[%s227_s3 + $0x18] sm:$0xff] %vm121_vm1, %v118_v15 }
  0xeb   :  { %123 = vst.msk [vmem:[%s227_s3 + $0x8] sm:$0xff] %vm121_vm1, %v110_v17 }

</bundles_post_ra>
